<compile_context>
chip_gen: v6e
topology: v6e:2x2x1
jax: 0.10.0
libtpu: 0.0.40
codegen_flags: <defaults>
</compile_context>

<pallas_src>
import functools
import math

import jax
import jax.numpy as jnp
from jax.experimental import pallas as pl
from jax.experimental.pallas import tpu as pltpu


# Inner chunk of lanes processed per iteration inside the kernel.  Bounds the
# (hidden, CB) f32 intermediate to 64*2048*4 = 512 KiB regardless of TB.
_CB = 2048


def _round_up(n, m):
    return ((n + m - 1) // m) * m


def _mlp_kernel(xt_ref, w1t_ref, w2t_ref, b2t_ref, ot_ref, *, cb):
    """xt_ref: (k_pad, TB)  w1t_ref: (hidden, k_pad) with b1 folded into the
    1.0-padded feature row, w2t_ref: (out, hidden), b2t_ref: (out, 1),
    ot_ref: (out, TB).  Processes the TB lanes in static cb-lane chunks."""
    tb = xt_ref.shape[-1]
    w1t = w1t_ref[...]
    w2t = w2t_ref[...]
    b2t = b2t_ref[...]
    # Static trip count (<= TB/CB = 16 at the default tile); static slices are
    # free and keep each chunk's (hidden, cb) intermediate small.
    for c in range(tb // cb):
        sl = slice(c * cb, (c + 1) * cb)
        # Layer 1 (+bias via the folded 1.0 row): (64, 8) @ (8, cb) -> (64, cb)
        h = jnp.dot(w1t, xt_ref[:, sl], preferred_element_type=jnp.float32)
        # LeakyReLU, PyTorch default negative_slope = 0.01 (mul + max)
        h = jnp.maximum(h, jnp.float32(0.01) * h)
        # Layer 2: (2, 64) @ (64, cb) -> (2, cb); bias is a tiny (2,1) add.
        out = jnp.dot(w2t, h, preferred_element_type=jnp.float32) + b2t
        ot_ref[:, sl] = out.astype(ot_ref.dtype)   # lane-dense, unmasked store


def _pick_tile(B, tb_max):
    """Pick the lane-axis batch tile TB (multiple of 128, and of _CB when
    chunked).  Splits a would-be single-step grid so v7x's two TensorCores
    both get work under dimension_semantics=("parallel",)."""
    tb_max = max(128, (tb_max // 128) * 128)
    nb = _round_up(B, 128)
    tb = min(tb_max, nb)
    # v7x megacore: ensure grid >= 2 when the batch is big enough to split.
    if tb >= nb and nb >= 2 * _CB:
        tb = _round_up(-(-B // 2), 128)
    # Keep the tile a multiple of the inner chunk (no ragged chunk tail).
    if tb > _CB:
        tb = _round_up(tb, _CB)
    return tb


def prepare_params(w1, b1, w2, b2):
    """Build the transposed, lane-dense weight operands once.

    Returns (w1t_aug, w2t, b2t, f_in, k_pad):
      w1t_aug: (hidden, k_pad) = [W1^T | b1 | 0...], bias folded into col f_in
      w2t:     (out, hidden)
      b2t:     (out, 1)
    """
    f_in, hidden = w1.shape
    out_dim = w2.shape[1]
    k_pad = _round_up(f_in + 1, 8)   # room for the bias row, full f32 sublanes
    w1t = jnp.zeros((hidden, k_pad), jnp.float32)
    w1t = w1t.at[:, :f_in].set(w1.T.astype(jnp.float32))
    w1t = w1t.at[:, f_in].set(b1.reshape(-1).astype(jnp.float32))
    w2t = w2.T.astype(jnp.float32)
    b2t = b2.reshape(out_dim, 1).astype(jnp.float32)
    return w1t, w2t, b2t, f_in, k_pad


def mlp_forward_t(xt, w1t_aug, w2t, b2t, tb_max=32768):
    """Transposed-layout entry point (preferred: no wrapper relayout).

    xt: (k_pad, b_pad) f32, lane-dense, rows [0:f_in) = features^T, row f_in
        = 1.0 (bias row), remaining rows 0, b_pad a multiple of 128.
    Returns out^T: (out_dim, b_pad) f32.
    """
    k_pad, b_pad = xt.shape
    hidden = w1t_aug.shape[0]
    out_dim = w2t.shape[0]

    TB = _pick_tile(b_pad, tb_max)
    # b_pad must already be a multiple of TB for a clean grid; pad if not.
    full = _round_up(b_pad, TB)
    if full != b_pad:
        xt = jnp.zeros((k_pad, full), jnp.float32).at[:, :b_pad].set(xt)
    grid = (full // TB,)
    cb = min(_CB, TB)

    out_t = pl.pallas_call(
        functools.partial(_mlp_kernel, cb=cb),
        out_shape=jax.ShapeDtypeStruct((out_dim, full), jnp.float32),
        grid=grid,
        in_specs=[
            pl.BlockSpec((k_pad, TB), lambda i: (0, i)),        # x^T tile
            pl.BlockSpec((hidden, k_pad), lambda i: (0, 0)),    # W1^T+b1 (resident)
            pl.BlockSpec((out_dim, hidden), lambda i: (0, 0)),  # W2^T    (resident)
            pl.BlockSpec((out_dim, 1), lambda i: (0, 0)),       # b2      (resident)
        ],
        out_specs=pl.BlockSpec((out_dim, TB), lambda i: (0, i)),
        compiler_params=pltpu.CompilerParams(
            dimension_semantics=("parallel",)),
    )(xt, w1t_aug, w2t, b2t)
    return out_t[:, :b_pad]


def _mlp_xla(x, w1, b1, w2, b2):
    """Fused plain-XLA path for tiny batches (launch-latency bound)."""
    h = x.astype(jnp.float32) @ w1.astype(jnp.float32) + b1.reshape(1, -1)
    h = jnp.maximum(h, 0.01 * h)
    return h @ w2.astype(jnp.float32) + b2.reshape(1, -1)


def mlp_forward(x, w1, b1, w2, b2, tb_max=32768, min_pallas_batch=1024):
    """Batch-major interface matching nn.Linear.

    x: (B, 7) f32, w1: (7, 64), b1: (1, 64), w2: (64, 2), b2: (1, 2) -> (B, 2).

    For B < min_pallas_batch a single fused XLA op is used (the pallas launch
    and the relayout dominate at tiny batches).  Pass min_pallas_batch=0 to
    force the Pallas path.  Callers that can produce/consume the transposed
    (features, batch) layout should call mlp_forward_t directly and skip the
    relayout below entirely.
    """
    B = x.shape[0]
    if B < min_pallas_batch:
        return _mlp_xla(x, w1, b1, w2, b2)

    w1t_aug, w2t, b2t, f_in, k_pad = prepare_params(w1, b1, w2, b2)

    TB = _pick_tile(B, tb_max)
    b_pad = _round_up(B, TB)

    # Lane-dense transposed input with the bias row set to 1.0.
    xt = jnp.zeros((k_pad, b_pad), jnp.float32)
    xt = xt.at[:f_in, :B].set(x.T.astype(jnp.float32))
    xt = xt.at[f_in, :].set(1.0)

    out_t = mlp_forward_t(xt, w1t_aug, w2t, b2t, tb_max=tb_max)
    # Drop batch padding, return batch-major like nn.Linear.
    return out_t[:, :B].T


def init_mlp_params(key, size_list=(7, 64, 2)):
    """nn.Linear default init: kaiming_uniform_(a=sqrt(5)) => bound = 1/sqrt(fan_in)."""
    params = []
    for i in range(len(size_list) - 1):
        fan_in, fan_out = size_list[i], size_list[i + 1]
        key, kw, kb = jax.random.split(key, 3)
        bound = 1.0 / math.sqrt(fan_in)
        # Stored as (in, out): transpose of PyTorch's (out, in) weight.
        w = jax.random.uniform(kw, (fan_in, fan_out), jnp.float32, -bound, bound)
        b = jax.random.uniform(kb, (1, fan_out), jnp.float32, -bound, bound)
        params.append((w, b))
    return params


def mlp_reference(x, params):
    """Plain-JAX reference of the PyTorch forward."""
    h = x
    n = len(params)
    for i, (w, b) in enumerate(params):
        h = h @ w + b
        if i != n - 1:
            h = jnp.where(h > 0, h, 0.01 * h)
    return h


if __name__ == "__main__":
    key = jax.random.PRNGKey(0)
    key, kx = jax.random.split(key)

    size_list = (7, 64, 2)
    (w1, b1), (w2, b2) = init_mlp_params(key, size_list)
    params = [(w1, b1), (w2, b2)]

    # 1) Small batch, Pallas path forced (single grid step, single chunk).
    B = 8
    x = jax.random.normal(kx, (B, size_list[0]), jnp.float32)
    out = jax.block_until_ready(mlp_forward(x, w1, b1, w2, b2, min_pallas_batch=0))
    ref = mlp_reference(x, params)
    assert out.shape == (B, size_list[-1])
    assert jnp.allclose(out, ref, atol=1e-4, rtol=1e-4), "mismatch (B=8, pallas)"

    # 2) Ragged batch, multi-step grid (TB=128, grid=3, tail padding).
    B2 = 300
    x2 = jax.random.normal(jax.random.fold_in(kx, 1), (B2, size_list[0]), jnp.float32)
    out2 = jax.block_until_ready(
        mlp_forward(x2, w1, b1, w2, b2, tb_max=128, min_pallas_batch=0))
    ref2 = mlp_reference(x2, params)
    assert out2.shape == (B2, size_list[-1])
    assert jnp.allclose(out2, ref2, atol=1e-4, rtol=1e-4), "mismatch (B=300, pallas)"

    # 3) Exercises the megacore split (grid=2) and the in-kernel chunk loop
    #    (TB=4096 -> 2 chunks of 2048 lanes per grid step).
    B3 = 5000
    x3 = jax.random.normal(jax.random.fold_in(kx, 2), (B3, size_list[0]), jnp.float32)
    out3 = jax.block_until_ready(mlp_forward(x3, w1, b1, w2, b2, min_pallas_batch=0))
    ref3 = mlp_reference(x3, params)
    assert out3.shape == (B3, size_list[-1])
    assert jnp.allclose(out3, ref3, atol=1e-4, rtol=1e-4), "mismatch (B=5000, pallas)"

    # 4) Default dispatch: tiny batch takes the fused-XLA fallback.
    out4 = jax.block_until_ready(mlp_forward(x, w1, b1, w2, b2))
    assert jnp.allclose(out4, ref, atol=1e-4, rtol=1e-4), "mismatch (B=8, xla fallback)"

    print("KERNEL_OK")
</pallas_src>

<mosaic_0001>
module attributes {stable_mosaic.version = 11 : i64} {
  func.func @_mlp_kernel(%arg0: i32, %arg1: memref<8x128xf32, #tpu.memory_space<vmem>>, %arg2: memref<64x8xf32, #tpu.memory_space<vmem>>, %arg3: memref<2x64xf32, #tpu.memory_space<vmem>>, %arg4: memref<2x1xf32, #tpu.memory_space<vmem>>, %arg5: memref<2x128xf32, #tpu.memory_space<vmem>>) attributes {dimension_semantics = [#tpu.dimension_semantics<parallel>], iteration_bounds = array<i64: 1>, scalar_prefetch = 0 : i64, scratch_operands = 0 : i64, tpu.core_type = #tpu.core_type<tc>, window_params = [{transform_indices = @transform_0, window_bounds = array<i64: 8, 128>}, {pipeline_mode = #tpu.pipeline_mode<synchronous>, transform_indices = @transform_1, window_bounds = array<i64: 64, 8>}, {pipeline_mode = #tpu.pipeline_mode<synchronous>, transform_indices = @transform_2, window_bounds = array<i64: 2, 64>}, {pipeline_mode = #tpu.pipeline_mode<synchronous>, transform_indices = @transform_3, window_bounds = array<i64: 2, 1>}, {transform_indices = @transform_4, window_bounds = array<i64: 2, 128>}]} {
    %c0 = arith.constant 0 : index
    %c0_0 = arith.constant 0 : index
    %0 = vector.load %arg2[%c0, %c0_0] : memref<64x8xf32, #tpu.memory_space<vmem>>, vector<64x8xf32>
    %c0_1 = arith.constant 0 : index
    %c0_2 = arith.constant 0 : index
    %1 = vector.load %arg3[%c0_1, %c0_2] : memref<2x64xf32, #tpu.memory_space<vmem>>, vector<2x64xf32>
    %c0_3 = arith.constant 0 : index
    %c0_4 = arith.constant 0 : index
    %2 = vector.load %arg4[%c0_3, %c0_4] : memref<2x1xf32, #tpu.memory_space<vmem>>, vector<2x1xf32>
    %c0_5 = arith.constant 0 : index
    %c0_6 = arith.constant 0 : index
    %3 = vector.load %arg1[%c0_5, %c0_6] : memref<8x128xf32, #tpu.memory_space<vmem>>, vector<8x128xf32>
    %cst = arith.constant dense<0.000000e+00> : vector<64x128xf32>
    %4 = tpu.matmul %0, %3, %cst {dimension_numbers = #tpu.dot_dimension_numbers<[1], [0], [0], [1], [0, 0, 1, 1], [], []>} : vector<64x8xf32>, vector<8x128xf32>, vector<64x128xf32> -> vector<64x128xf32>
    %cst_7 = arith.constant 0.00999999977 : f32
    %5 = vector.broadcast %cst_7 : f32 to vector<64x128xf32>
    %6 = arith.mulf %5, %4 : vector<64x128xf32>
    %7 = arith.maximumf %4, %6 : vector<64x128xf32>
    %cst_8 = arith.constant dense<0.000000e+00> : vector<2x128xf32>
    %8 = tpu.matmul %1, %7, %cst_8 {dimension_numbers = #tpu.dot_dimension_numbers<[1], [0], [0], [1], [0, 0, 1, 1], [], []>} : vector<2x64xf32>, vector<64x128xf32>, vector<2x128xf32> -> vector<2x128xf32>
    %9 = vector.broadcast %2 : vector<2x1xf32> to vector<2x128xf32>
    %10 = arith.addf %8, %9 : vector<2x128xf32>
    %c0_9 = arith.constant 0 : index
    %c0_10 = arith.constant 0 : index
    %11 = vector.load %arg5[%c0_9, %c0_10] : memref<2x128xf32, #tpu.memory_space<vmem>>, vector<2x128xf32>
    tpu.vector_store %arg5[%c0_9, %c0_10], %10 {strides = array<i32>} : memref<2x128xf32, #tpu.memory_space<vmem>>, vector<2x128xf32>,
    return
  }
  func.func @transform_0(%arg0: i32) -> (i32, i32) {
    %c0_i32 = arith.constant 0 : i32
    %c0_i32_0 = arith.constant 0 : i32
    return %c0_i32, %arg0 : i32, i32
  }
  func.func @transform_1(%arg0: i32) -> (i32, i32) {
    %c0_i32 = arith.constant 0 : i32
    %c0_i32_0 = arith.constant 0 : i32
    %c0_i32_1 = arith.constant 0 : i32
    return %c0_i32, %c0_i32_0 : i32, i32
  }
  func.func @transform_2(%arg0: i32) -> (i32, i32) {
    %c0_i32 = arith.constant 0 : i32
    %c0_i32_0 = arith.constant 0 : i32
    %c0_i32_1 = arith.constant 0 : i32
    return %c0_i32, %c0_i32_0 : i32, i32
  }
  func.func @transform_3(%arg0: i32) -> (i32, i32) {
    %c0_i32 = arith.constant 0 : i32
    %c0_i32_0 = arith.constant 0 : i32
    %c0_i32_1 = arith.constant 0 : i32
    return %c0_i32, %c0_i32_0 : i32, i32
  }
  func.func @transform_4(%arg0: i32) -> (i32, i32) {
    %c0_i32 = arith.constant 0 : i32
    %c0_i32_0 = arith.constant 0 : i32
    return %c0_i32, %arg0 : i32, i32
  }
}

</mosaic_0001>

<bundles_post_ra>
// kernel: tpu_custom_call.1
= control target key start
LH: loop header
LB: loop body
LE: loop exit
PB: predicated region body
PF: predicated region fallthrough
CT: control target
= control target key end

     0   :  { %vm29_vm0 = vcmask 64512   ;;  %s429_s0 = inlined_call_operand.vmem [shape: f32[8,128], index: 0, kind: input, shape index: {}]   ;;  %s430_s1 = inlined_call_operand.vmem [shape: f32[64,8], index: 1, kind: input, shape index: {}]   ;;  %s431_s2 = inlined_call_operand.vmem [shape: f32[2,64], index: 2, kind: input, shape index: {}]   ;;  %s432_s3 = inlined_call_operand.vmem [shape: f32[2,1], index: 3, kind: input, shape index: {}]   ;;  %s433_s4 = inlined_call_operand.hbm [shape: f32[2,128], index: 4, kind: output, shape index: {}]  }
   0x1   :  { %v28_v0 = vld [vmem:[%s429_s0] sm:$0xff]  ;;  %v19_v2 = vld [vmem:[%s430_s1 + $0x8] sm:$0xff]  ;;  %v20_v3 = vld [vmem:[%s430_s1 + $0x10] sm:$0xff] }
   0x2   :  { %v18_v1 = vld [vmem:[%s430_s1] sm:$0xff]  ;;  %296 = vmatprep.subr.mxu0 %v28_v0 }
   0x3   :  { %298 = vmatprep.mubr.msk.f32.mxu0 %vm29_vm0, %v18_v1  ;;  %297 = vmatpush3.msra.mxu0 %v28_v0 }
   0x4   :  { %299 = vmatmul.mubr.msk.f32.vlgmr.msra.gmra.mxu0 %vm29_vm0, %v19_v2 }
   0x5   :  { %9 = vsyncpa [#allocation3], 0  ;;  %301 = vmatprep.mubr.msk.f32.mxu0 %vm29_vm0, %v20_v3  ;;  %v21_v4 = vld [vmem:[%s430_s1 + $0x18] sm:$0xff]  ;;  %v22_v5 = vld [vmem:[%s430_s1 + $0x20] sm:$0xff]  ;;  %v356_v9 = vmov 0.0   ;;  %vm357_vm1 = vmmov 0  }
   0x6   :  { %v23_v6 = vld [vmem:[%s430_s1 + $0x28] sm:$0xff]  ;;  %v24_v7 = vld [vmem:[%s430_s1 + $0x30] sm:$0xff]  ;;  %v25_v8 = vld [vmem:[%s430_s1 + $0x38] sm:$0xff]  ;;  %310 = vmatprep.subr.mxu1 %v356_v9  ;;  %326 = vmatprep.mubr.msk.f32.mxu1 %vm357_vm1, %v356_v9  ;;  %v358_v11 = vmov 0   ;;  %vm180_vm2 = vcmask 523264   ;;  %s359_s8 = smov [#allocation2]  }
   0x7   :  { %v27_v10 = vld [vmem:[%s432_s3] sm:$0x3]  ;;  %333 = vset.pattern.permute.xlu0 %v358_v11  ;;  %s261_s9 = sshll.u32 %s359_s8, 4  ;;  %s262_s9 = int_to_ptr.vmem [resolvable:$true] %s261_s9 }
   0x8   :  { %302 = vmatmul.mubr.msk.f32.gmra.mxu0 %vm29_vm0, %v21_v4  ;;  %177 = vperm.xlu0 %333, %v27_v10   ;;  %v26_v36 = vld [vmem:[%s431_s2] sm:$0x3]  ;;  %s334_s10 = scalar_lea.vmem %s262_s9, 32  ;;  %p339_p1 = scmp.lt.s32.totalorder %s262_s9, %s262_s9 }
   0x9   :  { %304 = vmatprep.mubr.msk.f32.mxu0 %vm29_vm0, %v22_v5  ;;  %p335_p0 = scmp.ne.s32.totalorder %s262_s9, %s334_s10  ;;  %p340_p2 = scmp.lt.s32.totalorder %s334_s10, %s334_s10 }
   0xb   :  { %p341_p3 = por %p340_p2, %p339_p1 }
   0xc   :  { %305 = vmatmul.mubr.msk.f32.gmra.mxu0 %vm29_vm0, %v23_v6 }
   0xd   :  { %307 = vmatprep.mubr.msk.f32.mxu0 %vm29_vm0, %v24_v7  ;;  %p342_p4 = pnand %p341_p3, %p335_p0 }
  0x10   :  { %308 = vmatmul.mubr.msk.f32.gmra.mxu0 %vm29_vm0, %v25_v8 }
  0x83   :  { %v178_v37 = vpop.permute.xlu0 %177 }
  0xc4   :  { %v300_v12 = vpop.f32.mrf.mxu0 }
  0xc5   :  { %v160_v30 = vmul.f32 0.01, %v300_v12 }
  0xc6   :  { %v120_v13 = vpop.f32.mrf.mxu0 }
  0xc7   :  { %v159_v32 = vmul.f32 0.01, %v120_v13  ;;  %v168_v34 = vmax.f32 %v300_v12, %v160_v30 }
  0xc8   :  { %v303_v14 = vpop.f32.mrf.mxu0 }
  0xc9   :  { %v162_v26 = vmul.f32 0.01, %v303_v14  ;;  %v167_v35 = vmax.f32 %v120_v13, %v159_v32 }
  0xca   :  { %v130_v15 = vpop.f32.mrf.mxu0 }
  0xcb   :  { %v161_v28 = vmul.f32 0.01, %v130_v15  ;;  %v170_v31 = vmax.f32 %v303_v14, %v162_v26 }
  0xcc   :  { %v306_v16 = vpop.f32.mrf.mxu0 }
  0xcd   :  { %v164_v21 = vmul.f32 0.01, %v306_v16  ;;  %v169_v33 = vmax.f32 %v130_v15, %v161_v28 }
  0xce   :  { %v140_v17 = vpop.f32.mrf.mxu0 }
  0xcf   :  { %v163_v24 = vmul.f32 0.01, %v140_v17  ;;  %v172_v27 = vmax.f32 %v306_v16, %v164_v21 }
  0xd0   :  { %v309_v18 = vpop.f32.mrf.mxu0 }
  0xd1   :  { %v166_v19 = vmul.f32 0.01, %v309_v18  ;;  %v171_v29 = vmax.f32 %v140_v17, %v163_v24 }
  0xd2   :  { %v150_v20 = vpop.f32.mrf.mxu0 }
  0xd3   :  { %v165_v22 = vmul.f32 0.01, %v150_v20  ;;  %v174_v23 = vmax.f32 %v309_v18, %v166_v19 }
  0xd5   :  { %v173_v25 = vmax.f32 %v150_v20, %v165_v22  ;;  %311 = vmatpush3.msra.mxu1 %v174_v23 }
  0xd6   :  { %312 = vmatprep.subr.mxu1 %v356_v9 }
  0xd7   :  { %313 = vmatpush3.msra.mxu1 %v173_v25 }
  0xd8   :  { %314 = vmatprep.subr.mxu1 %v356_v9 }
  0xd9   :  { %315 = vmatpush3.msra.mxu1 %v172_v27 }
  0xda   :  { %316 = vmatprep.subr.mxu1 %v356_v9 }
  0xdb   :  { %317 = vmatpush3.msra.mxu1 %v171_v29 }
  0xdc   :  { %318 = vmatprep.subr.mxu1 %v356_v9 }
  0xdd   :  { %319 = vmatpush3.msra.mxu1 %v170_v31 }
  0xde   :  { %320 = vmatprep.subr.mxu1 %v356_v9 }
  0xdf   :  { %321 = vmatpush3.msra.mxu1 %v169_v33 }
  0xe0   :  { %322 = vmatprep.subr.mxu1 %v356_v9 }
  0xe1   :  { %323 = vmatpush3.msra.mxu1 %v168_v34 }
  0xe2   :  { %324 = vmatprep.subr.mxu1 %v356_v9 }
  0xe3   :  { %325 = vmatpush3.msra.mxu1 %v167_v35 }
  0xe4   :  { %327 = vmatmul.mubr.msk.f32.vlgmr.msra.gmra.mxu1 %vm180_vm2, %v26_v36 }
 0x1a4   :  { %v250_v38 = vpop.f32.mrf.mxu1 }
 0x1a5   :  { %v251_v39 = vadd.f32 %v250_v38, %v178_v37 }
 0x1a6   :  { %v328_v40 = vpop.f32.mrf.mxu1 }
 0x1a7   :  { %254 = vst [vmem:[#allocation2] sm:$0x3] %v251_v39 }
 0x1a8   :  { %345 = shalt.err (!%p342_p4)
}
 0x1a9   :  { %264 = dma.vmem_to_hbm [thread:$0]  %s262_s9, 32, %s433_s4, [#allocation3]  }
 0x1aa   :  { %354 = dma.done.wait [#allocation3], 32  }
 0x1ab   :  { %355 = vsyncadd [#allocation3], 4294967264 }
 0x1ac   :  { %268 = vsyncpa [#allocation3], 1 }

</bundles_post_ra>
